<compile_context>
chip_gen: v5e
topology: v5e:2x2
jax: 0.10.0
libtpu: 0.0.40
codegen_flags: <defaults>
</compile_context>

<pallas_src>
import functools

import jax
import jax.numpy as jnp
from jax.experimental import pallas as pl
from jax.experimental.pallas import tpu as pltpu


def _round_up(x, m):
    return ((x + m - 1) // m) * m


def _combined_loss_kernel(logits_ref, side_ref, out_ref, acc_ce_ref, acc_mse_ref, *,
                          n_rows, ce_scale, mse_scale, needs_mask):
    p = pl.program_id(0)          # parallel (per-TensorCore) axis
    j = pl.program_id(1)          # sequential reduction axis
    steps = pl.num_programs(1)

    @pl.when(j == 0)
    def _():
        acc_ce_ref[...] = jnp.zeros_like(acc_ce_ref)
        acc_mse_ref[...] = jnp.zeros_like(acc_mse_ref)

    # Stream the tile in its native dtype; upcast to f32 on the VPU.
    logits = logits_ref[...].astype(jnp.float32)             # (TM, C)
    side = side_ref[...]                                      # (TM, 2) f32: [reg, label]
    tm, c = logits.shape

    if needs_mask:
        blk = p * steps + j                                   # logical (unclamped) row block
        row_ids = blk * tm + jax.lax.broadcasted_iota(jnp.int32, (tm, 1), 0)
        valid = row_ids < n_rows                              # (TM, 1)
        # Zero-fill padded / duplicated rows so exp & friends stay finite.
        logits = jnp.where(valid, logits, 0.0)
        side = jnp.where(valid, side, 0.0)

    reg = side[:, 0:1]                                        # (TM, 1)
    labels_f = side[:, 1:2]                                   # (TM, 1) class id as f32 (exact)
    labels_i = labels_f.astype(jnp.int32)

    # --- cross entropy rows: logsumexp(logits) - logits[label] (numerically stable) ---
    m = jnp.max(logits, axis=-1, keepdims=True)               # (TM, 1)
    sumexp = jnp.sum(jnp.exp(logits - m), axis=-1, keepdims=True)
    col_ids = jax.lax.broadcasted_iota(jnp.int32, (tm, c), 1)  # one-hot gather (no dyn gather)
    true_logit = jnp.sum(jnp.where(col_ids == labels_i, logits, 0.0),
                         axis=-1, keepdims=True)              # (TM, 1)
    ce_rows = jnp.log(sumexp) + m - true_logit                # (TM, 1)

    # --- MSE rows against labels cast to float ---
    diff = reg - labels_f
    mse_rows = diff * diff                                     # (TM, 1)

    if needs_mask:
        zeros = jnp.zeros_like(ce_rows)
        ce_rows = jnp.where(valid, ce_rows, zeros)
        mse_rows = jnp.where(valid, mse_rows, zeros)

    # Vector accumulation; cross-sublane reduction deferred to finalize.
    acc_ce_ref[...] += ce_rows
    acc_mse_ref[...] += mse_rows

    @pl.when(j == steps - 1)
    def _():
        ce_sum = jnp.sum(acc_ce_ref[...], axis=0, keepdims=True)     # (1, 1)
        mse_sum = jnp.sum(acc_mse_ref[...], axis=0, keepdims=True)   # (1, 1)
        partial = ce_scale * ce_sum + mse_scale * mse_sum            # (1, 1), scales folded
        out_ref[...] = jnp.broadcast_to(partial.reshape(1, 1, 1), out_ref.shape)


def combined_loss(outputs_clf, outputs_reg, labels, ratio=0.5, block_rows=None,
                  target_block_bytes=4 * 1024 * 1024):
    """outputs_clf: (N, C) float logits (any float dtype), outputs_reg: (N,) float,
    labels: (N,) int class indices."""
    n, c = outputs_clf.shape
    itemsize = jnp.dtype(outputs_clf.dtype).itemsize
    sub = max(8, 32 // itemsize)          # sublane multiple: 8 for f32, 16 for bf16

    # Fuse the two tiny side inputs into one (N, 2) f32 array -> single side DMA per tile.
    # Labels are value-cast to f32 (exact for class indices < 2**24).
    side = jnp.stack([outputs_reg.astype(jnp.float32),
                      labels.astype(jnp.float32)], axis=-1)          # (N, 2)

    if block_rows is None:
        # Byte-budget sizing: ~target bytes of logits per pipeline buffer (x2 double-buffered),
        # safe on v7x's 64 MiB VMEM.  Cap rows so lane-sparse (TM,1) f32 temps stay small.
        # (On v5e, target_block_bytes can be raised to ~16 MiB for a small extra win.)
        rows_budget = max(sub, target_block_bytes // (c * itemsize))
        block_rows = min(rows_budget, 2048)
    tm = max(sub, min(int(block_rows), _round_up(n, sub)))
    tm = _round_up(tm, sub)

    num_blocks = pl.cdiv(n, tm)
    num_cores = 2 if num_blocks >= 2 else 1     # 2-way parallel axis; serial loop on 1-TC chips
    steps = pl.cdiv(num_blocks, num_cores)
    needs_mask = (n % tm != 0) or (num_blocks != num_cores * steps)

    if num_blocks == num_cores * steps:
        def row_index(p, j):
            return (p * steps + j, 0)
    else:
        # Clamp so every DMA stays in bounds; duplicated blocks are fully masked out.
        def row_index(p, j):
            return (jnp.minimum(p * steps + j, num_blocks - 1), 0)

    kernel = functools.partial(
        _combined_loss_kernel,
        n_rows=n,
        ce_scale=float(ratio) / float(n),            # folded compile-time constants
        mse_scale=(1.0 - float(ratio)) / float(n),
        needs_mask=needs_mask,
    )

    partials = pl.pallas_call(
        kernel,
        out_shape=jax.ShapeDtypeStruct((num_cores, 8, 128), jnp.float32),
        grid=(num_cores, steps),
        in_specs=[
            pl.BlockSpec((tm, c), row_index),        # logits streamed in native dtype
            pl.BlockSpec((tm, 2), row_index),        # fused [reg, label] side tile
        ],
        out_specs=pl.BlockSpec((1, 8, 128), lambda p, j: (p, 0, 0)),   # per-core partial
        scratch_shapes=[
            pltpu.VMEM((tm, 1), jnp.float32),        # per-row CE accumulator
            pltpu.VMEM((tm, 1), jnp.float32),        # per-row MSE accumulator
        ],
        compiler_params=pltpu.CompilerParams(
            dimension_semantics=("parallel", "arbitrary"),
            vmem_limit_bytes=40 * 1024 * 1024,       # headroom even on v7x (64 MiB physical)
        ),
        cost_estimate=pl.CostEstimate(
            flops=5 * n * c,
            transcendentals=n * c,
            bytes_accessed=n * c * itemsize + 8 * n + num_cores * 8 * 128 * 4,
        ),
    )(outputs_clf, side)

    # Per-core partials are already scaled by ratio/N and (1-ratio)/N; just add them.
    return jnp.sum(partials[:, 0, 0])


def _reference_loss(outputs_clf, outputs_reg, labels, ratio=0.5):
    # Plain-JAX reference reproducing torch CrossEntropyLoss + MSELoss (mean) semantics.
    logits = outputs_clf.astype(jnp.float32)
    logsumexp = jax.scipy.special.logsumexp(logits, axis=-1)
    true_logit = jnp.take_along_axis(logits, labels[:, None], axis=-1)[:, 0]
    ce = jnp.mean(logsumexp - true_logit)
    mse = jnp.mean((outputs_reg.astype(jnp.float32) - labels.astype(jnp.float32)) ** 2)
    return ratio * ce + (1.0 - ratio) * mse


if __name__ == "__main__":
    key = jax.random.PRNGKey(0)
    k1, k2, k3 = jax.random.split(key, 3)

    N, C = 20, 32  # small batch (not a multiple of the tile), 32 classes
    outputs_clf = jax.random.normal(k1, (N, C), dtype=jnp.float32)
    outputs_reg = jax.random.normal(k2, (N,), dtype=jnp.float32)
    labels = jax.random.randint(k3, (N,), 0, C, dtype=jnp.int32)

    ref = _reference_loss(outputs_clf, outputs_reg, labels, ratio=0.5)

    # Multi-block grid over the 2-way parallel axis + partial last tile + a clamped
    # duplicate block (3 row blocks -> grid (2, 2)).
    loss_tiled = jax.block_until_ready(
        combined_loss(outputs_clf, outputs_reg, labels, ratio=0.5, block_rows=8))
    assert jnp.allclose(loss_tiled, ref, rtol=1e-5, atol=1e-5), (loss_tiled, ref)

    # Default byte-budget tile sizing (single block at this small N).
    loss_default = jax.block_until_ready(
        combined_loss(outputs_clf, outputs_reg, labels, ratio=0.5))
    assert jnp.allclose(loss_default, ref, rtol=1e-5, atol=1e-5), (loss_default, ref)

    # bf16 logits streamed in their native dtype (no wrapper upcast), TM rounded to 16.
    clf_bf16 = outputs_clf.astype(jnp.bfloat16)
    ref_bf16 = _reference_loss(clf_bf16, outputs_reg, labels, ratio=0.5)
    loss_bf16 = jax.block_until_ready(
        combined_loss(clf_bf16, outputs_reg, labels, ratio=0.5, block_rows=8))
    assert jnp.allclose(loss_bf16, ref_bf16, rtol=1e-5, atol=1e-5), (loss_bf16, ref_bf16)

    print("KERNEL_OK")
</pallas_src>

<mosaic_0001>
module attributes {stable_mosaic.version = 11 : i64} {
  func.func @_combined_loss_kernel(%arg0: i32, %arg1: i32, %arg2: memref<8x32xf32, #tpu.memory_space<vmem>>, %arg3: memref<8x2xf32, #tpu.memory_space<vmem>>, %arg4: memref<1x8x128xf32, #tpu.memory_space<vmem>>, %arg5: memref<8x1xf32, #tpu.memory_space<vmem>>, %arg6: memref<8x1xf32, #tpu.memory_space<vmem>>) attributes {dimension_semantics = [#tpu.dimension_semantics<parallel>, #tpu.dimension_semantics<arbitrary>], iteration_bounds = array<i64: 2, 2>, scalar_prefetch = 0 : i64, scratch_operands = 2 : i64, tpu.core_type = #tpu.core_type<tc>, window_params = [{transform_indices = @transform_0, window_bounds = array<i64: 8, 32>}, {transform_indices = @transform_1, window_bounds = array<i64: 8, 2>}, {transform_indices = @transform_2, window_bounds = array<i64: 1, 8, 128>}]} {
    %c0_i32 = arith.constant 0 : i32
    %0 = arith.cmpi eq, %arg1, %c0_i32 : i32
    %1 = arith.extui %0 : i1 to i32
    %c0_i32_0 = arith.constant 0 : i32
    %2 = arith.cmpi ne, %1, %c0_i32_0 : i32
    scf.if %2 {
      %cst_19 = arith.constant 0.000000e+00 : f32
      %55 = vector.broadcast %cst_19 : f32 to vector<8x1xf32>
      %c0_20 = arith.constant 0 : index
      %c0_21 = arith.constant 0 : index
      %56 = vector.load %arg5[%c0_20, %c0_21] : memref<8x1xf32, #tpu.memory_space<vmem>>, vector<8x1xf32>
      tpu.vector_store %arg5[%c0_20, %c0_21], %55 {strides = array<i32>} : memref<8x1xf32, #tpu.memory_space<vmem>>, vector<8x1xf32>,
      %cst_22 = arith.constant 0.000000e+00 : f32
      %57 = vector.broadcast %cst_22 : f32 to vector<8x1xf32>
      %c0_23 = arith.constant 0 : index
      %c0_24 = arith.constant 0 : index
      %58 = vector.load %arg6[%c0_23, %c0_24] : memref<8x1xf32, #tpu.memory_space<vmem>>, vector<8x1xf32>
      tpu.vector_store %arg6[%c0_23, %c0_24], %57 {strides = array<i32>} : memref<8x1xf32, #tpu.memory_space<vmem>>, vector<8x1xf32>,
    } else {
    }
    %c0 = arith.constant 0 : index
    %c0_1 = arith.constant 0 : index
    %3 = vector.load %arg2[%c0, %c0_1] : memref<8x32xf32, #tpu.memory_space<vmem>>, vector<8x32xf32>
    %c0_2 = arith.constant 0 : index
    %c0_3 = arith.constant 0 : index
    %4 = vector.load %arg3[%c0_2, %c0_3] : memref<8x2xf32, #tpu.memory_space<vmem>>, vector<8x2xf32>
    %c2_i32 = arith.constant 2 : i32
    %5 = arith.muli %arg0, %c2_i32 : i32
    %6 = arith.addi %5, %arg1 : i32
    %c8_i32 = arith.constant 8 : i32
    %7 = arith.muli %6, %c8_i32 : i32
    %8 = tpu.iota {dimensions = array<i32: 0>} : vector<8x1xi32>
    %9 = vector.broadcast %7 : i32 to vector<8x1xi32>
    %10 = arith.addi %9, %8 : vector<8x1xi32>
    %c20_i32 = arith.constant 20 : i32
    %11 = vector.broadcast %c20_i32 : i32 to vector<8x1xi32>
    %12 = arith.cmpi slt, %10, %11 : vector<8x1xi32>
    %cst = arith.constant 0.000000e+00 : f32
    %13 = vector.shape_cast %12 : vector<8x1xi1> to vector<8x1xi1>
    %14 = vector.broadcast %13 : vector<8x1xi1> to vector<8x32xi1>
    %15 = vector.broadcast %cst : f32 to vector<8x32xf32>
    %16 = arith.select %14, %3, %15 : vector<8x32xi1>, vector<8x32xf32>
    %cst_4 = arith.constant 0.000000e+00 : f32
    %17 = vector.shape_cast %12 : vector<8x1xi1> to vector<8x1xi1>
    %18 = vector.broadcast %17 : vector<8x1xi1> to vector<8x2xi1>
    %19 = vector.broadcast %cst_4 : f32 to vector<8x2xf32>
    %20 = arith.select %18, %4, %19 : vector<8x2xi1>, vector<8x2xf32>
    %21 = vector.extract_strided_slice %20 {offsets = [0, 0], sizes = [8, 1], strides = [1, 1]} : vector<8x2xf32> to vector<8x1xf32>
    %22 = vector.extract_strided_slice %20 {offsets = [0, 1], sizes = [8, 1], strides = [1, 1]} : vector<8x2xf32> to vector<8x1xf32>
    %23 = arith.fptosi %22 : vector<8x1xf32> to vector<8x1xi32>
    %cst_5 = arith.constant dense<0xFF800000> : vector<8xf32>
    %24 = vector.multi_reduction <maximumf>, %16, %cst_5 [1] : vector<8x32xf32> to vector<8xf32>
    %25 = vector.shape_cast %24 : vector<8xf32> to vector<8x1xf32>
    %26 = vector.broadcast %25 : vector<8x1xf32> to vector<8x32xf32>
    %27 = arith.subf %16, %26 : vector<8x32xf32>
    %28 = math.exp %27 : vector<8x32xf32>
    %cst_6 = arith.constant dense<0.000000e+00> : vector<8xf32>
    %29 = vector.multi_reduction <add>, %28, %cst_6 [1] : vector<8x32xf32> to vector<8xf32>
    %30 = vector.shape_cast %29 : vector<8xf32> to vector<8x1xf32>
    %31 = tpu.iota {dimensions = array<i32: 1>} : vector<8x32xi32>
    %32 = vector.broadcast %23 : vector<8x1xi32> to vector<8x32xi32>
    %33 = arith.cmpi eq, %31, %32 : vector<8x32xi32>
    %cst_7 = arith.constant 0.000000e+00 : f32
    %34 = vector.broadcast %cst_7 : f32 to vector<8x32xf32>
    %35 = arith.select %33, %16, %34 : vector<8x32xi1>, vector<8x32xf32>
    %cst_8 = arith.constant dense<0.000000e+00> : vector<8xf32>
    %36 = vector.multi_reduction <add>, %35, %cst_8 [1] : vector<8x32xf32> to vector<8xf32>
    %37 = vector.shape_cast %36 : vector<8xf32> to vector<8x1xf32>
    %38 = math.log %30 : vector<8x1xf32>
    %39 = arith.addf %38, %25 : vector<8x1xf32>
    %40 = arith.subf %39, %37 : vector<8x1xf32>
    %41 = arith.subf %21, %22 : vector<8x1xf32>
    %42 = arith.mulf %41, %41 : vector<8x1xf32>
    %cst_9 = arith.constant 0.000000e+00 : f32
    %43 = vector.broadcast %cst_9 : f32 to vector<8x1xf32>
    %44 = arith.select %12, %40, %43 : vector<8x1xi1>, vector<8x1xf32>
    %45 = arith.select %12, %42, %43 : vector<8x1xi1>, vector<8x1xf32>
    %c0_10 = arith.constant 0 : index
    %c0_11 = arith.constant 0 : index
    %46 = vector.load %arg5[%c0_10, %c0_11] : memref<8x1xf32, #tpu.memory_space<vmem>>, vector<8x1xf32>
    %47 = arith.addf %46, %44 : vector<8x1xf32>
    %c0_12 = arith.constant 0 : index
    %c0_13 = arith.constant 0 : index
    %48 = vector.load %arg5[%c0_12, %c0_13] : memref<8x1xf32, #tpu.memory_space<vmem>>, vector<8x1xf32>
    tpu.vector_store %arg5[%c0_12, %c0_13], %47 {strides = array<i32>} : memref<8x1xf32, #tpu.memory_space<vmem>>, vector<8x1xf32>,
    %c0_14 = arith.constant 0 : index
    %c0_15 = arith.constant 0 : index
    %49 = vector.load %arg6[%c0_14, %c0_15] : memref<8x1xf32, #tpu.memory_space<vmem>>, vector<8x1xf32>
    %50 = arith.addf %49, %45 : vector<8x1xf32>
    %c0_16 = arith.constant 0 : index
    %c0_17 = arith.constant 0 : index
    %51 = vector.load %arg6[%c0_16, %c0_17] : memref<8x1xf32, #tpu.memory_space<vmem>>, vector<8x1xf32>
    tpu.vector_store %arg6[%c0_16, %c0_17], %50 {strides = array<i32>} : memref<8x1xf32, #tpu.memory_space<vmem>>, vector<8x1xf32>,
    %c1_i32 = arith.constant 1 : i32
    %52 = arith.cmpi eq, %arg1, %c1_i32 : i32
    %53 = arith.extui %52 : i1 to i32
    %c0_i32_18 = arith.constant 0 : i32
    %54 = arith.cmpi ne, %53, %c0_i32_18 : i32
    scf.if %54 {
      %c0_19 = arith.constant 0 : index
      %c0_20 = arith.constant 0 : index
      %55 = vector.load %arg5[%c0_19, %c0_20] : memref<8x1xf32, #tpu.memory_space<vmem>>, vector<8x1xf32>
      %cst_21 = arith.constant dense<0.000000e+00> : vector<1xf32>
      %56 = vector.multi_reduction <add>, %55, %cst_21 [0] : vector<8x1xf32> to vector<1xf32>
      %57 = vector.shape_cast %56 : vector<1xf32> to vector<1x1xf32>
      %c0_22 = arith.constant 0 : index
      %c0_23 = arith.constant 0 : index
      %58 = vector.load %arg6[%c0_22, %c0_23] : memref<8x1xf32, #tpu.memory_space<vmem>>, vector<8x1xf32>
      %cst_24 = arith.constant dense<0.000000e+00> : vector<1xf32>
      %59 = vector.multi_reduction <add>, %58, %cst_24 [0] : vector<8x1xf32> to vector<1xf32>
      %60 = vector.shape_cast %59 : vector<1xf32> to vector<1x1xf32>
      %cst_25 = arith.constant 2.500000e-02 : f32
      %61 = vector.broadcast %cst_25 : f32 to vector<1x1xf32>
      %62 = arith.mulf %61, %57 : vector<1x1xf32>
      %cst_26 = arith.constant 2.500000e-02 : f32
      %63 = vector.broadcast %cst_26 : f32 to vector<1x1xf32>
      %64 = arith.mulf %63, %60 : vector<1x1xf32>
      %65 = arith.addf %62, %64 : vector<1x1xf32>
      %66 = vector.shape_cast %65 : vector<1x1xf32> to vector<1x1x1xf32>
      %67 = vector.shape_cast %66 : vector<1x1x1xf32> to vector<1x1x1xf32>
      %68 = vector.broadcast %67 : vector<1x1x1xf32> to vector<1x8x128xf32>
      %c0_27 = arith.constant 0 : index
      %c0_28 = arith.constant 0 : index
      %c0_29 = arith.constant 0 : index
      %69 = vector.load %arg4[%c0_27, %c0_28, %c0_29] : memref<1x8x128xf32, #tpu.memory_space<vmem>>, vector<1x8x128xf32>
      tpu.vector_store %arg4[%c0_27, %c0_28, %c0_29], %68 {strides = array<i32>} : memref<1x8x128xf32, #tpu.memory_space<vmem>>, vector<1x8x128xf32>,
    } else {
    }
    return
  }
  func.func @transform_0(%arg0: i32, %arg1: i32) -> (i32, i32) {
    %c2_i32 = arith.constant 2 : i32
    %0 = arith.muli %arg0, %c2_i32 : i32
    %1 = arith.addi %0, %arg1 : i32
    %c2_i32_0 = arith.constant 2 : i32
    %2 = arith.minsi %1, %c2_i32_0 : i32
    %c0_i32 = arith.constant 0 : i32
    %c0_i32_1 = arith.constant 0 : i32
    return %2, %c0_i32 : i32, i32
  }
  func.func @transform_1(%arg0: i32, %arg1: i32) -> (i32, i32) {
    %c2_i32 = arith.constant 2 : i32
    %0 = arith.muli %arg0, %c2_i32 : i32
    %1 = arith.addi %0, %arg1 : i32
    %c2_i32_0 = arith.constant 2 : i32
    %2 = arith.minsi %1, %c2_i32_0 : i32
    %c0_i32 = arith.constant 0 : i32
    %c0_i32_1 = arith.constant 0 : i32
    return %2, %c0_i32 : i32, i32
  }
  func.func @transform_2(%arg0: i32, %arg1: i32) -> (i32, i32, i32) {
    %c0_i32 = arith.constant 0 : i32
    %c0_i32_0 = arith.constant 0 : i32
    %c0_i32_1 = arith.constant 0 : i32
    return %arg0, %c0_i32, %c0_i32_0 : i32, i32, i32
  }
}

</mosaic_0001>

<bundles_post_ra>
// kernel: tpu_custom_call.1
= control target key start
LH: loop header
LB: loop body
LE: loop exit
PB: predicated region body
PF: predicated region fallthrough
CT: control target
= control target key end

     0   :  { %7 = vsyncpa [#allocation5], 0  ;;  %s785_s0 = inlined_call_operand.vmem [shape: f32[20,32], index: 0, kind: input, shape index: {}]   ;;  %s786_s1 = inlined_call_operand.vmem [shape: f32[20,2], index: 1, kind: input, shape index: {}]   ;;  %s787_s2 = inlined_call_operand.hbm [shape: f32[2,8,128], index: 2, kind: output, shape index: {}]  }
   0x1   :  { %9 = vsyncpa [#allocation5 + $0x1], 0  ;;  %s641_s9 = smov 0   ;;  %s643_s10 = smov 0  }
   0x2   :  { %s645_s11 = smov 0   ;;  %s647_s12 = smov 0  }
   0x3   :  { %s649_s13 = smov 0   ;;  %s651_s14 = smov 0  }
   0x4   :  { %s653_s15 = smov 0   ;;  %s655_s16 = smov 0  }
   0x5 LB: > { %s412_s17 = sadd.s32 4294967295, %s620_s16   ;;  %s413_s18 = sadd.s32 4294967294, %s620_s16   ;;  %s620_s16 = sphi %s655_s16, %s15_s16   ;;  %s616_s15 = sphi %s653_s15, %s796_s15   ;;  %s612_s14 = sphi %s651_s14, %s795_s14   ;;  %s608_s13 = sphi %s649_s13, %s794_s13   ;;  %s604_s12 = sphi %s647_s12, %s793_s12   ;;  %s600_s11 = sphi %s645_s11, %s792_s11   ;;  %s596_s10 = sphi %s643_s10, %s791_s10   ;;  %s592_s9 = sphi %s641_s9, %s790_s9  }
   0x6   : > { %s24_s19 = sadd.s32 1, %s612_s14  ;;  %s27_s20 = sadd.s32 1, %s616_s15 }
   0x7   : > { %p25_p0 = scmp.ge.s32.totalorder %s24_s19, 2  ;;  %p112_p1 = scmp.ne.s32.totalorder %s600_s11, %s596_s10 }
   0x8   : > { %p113_p2 = scmp.eq.s32.totalorder %s412_s17, 3  ;;  %p118_p4 = scmp.ne.s32.totalorder %s596_s10, %s592_s9 }
   0x9   : > { %s798_s19 = smov (%p25_p0, %s24_s19), 0  ;;  %s800_s20 = smov (!%p25_p0, %s27_s20), %s616_s15 }
   0xa   : > { %p690_p3 = por %p113_p2, %p112_p1  ;;  %p29_p5 = scmp.ge.s32.totalorder %s800_s20, 2 }
   0xb   : > { %p119_p6 = scmp.eq.s32.totalorder %s413_s18, 3  ;;  %p420_p7 = scmp.ge.s32.totalorder %s620_s16, 1 }
   0xc   : > { %p167_p8 = scmp.lt.s32.totalorder %s620_s16, 5  ;;  %s802_s20 = smov (%p29_p5, %s800_s20), 0 }
   0xd   : > { %p700_p9 = por %p119_p6, %p118_p4  ;;  %s99_s23 = ssub.s32 %s616_s15, %s802_s20 }
   0xe   : > { %p168_p10 = pnand %p420_p7, %p167_p8  ;;  %s102_s24 = sadd.s32 1, %s600_s11 }
   0xf   : > { %p100_p11 = scmp.eq.s32.totalorder %s99_s23, 0  ;;  %s197_s26 = sand.u32 (!%p168_p10), 1, %s596_s10  }
  0x10   : > { %171 = sbr.rel (%p168_p10) target bundleno = 470 (0x1d6), region = 28  ;;  %s422_s27 = sshll.u32 (!%p168_p10), %s608_s13, 1 }
  0x11   : > { %s708_s25 = scalar_select %p100_p11, %s600_s11, %s102_s24  }
  0x12   : > { %s714_s28 = sshll.u32 (!%p168_p10), %s197_s26, 3  ;;  %s201_s29 = sadd.s32 (!%p168_p10), %s604_s12, %s422_s27 }
  0x13   : > { %p202_p12 = scmp.lt.s32.totalorder (!%p168_p10), %s201_s29, 2  ;;  %s199_s18 = scalar_lea.vmem (!%p168_p10), [#allocation4], %s714_s28 }
  0x14   : > { %p432_p13 = scmp.ne.s32.totalorder (!%p168_p10), %s604_s12, 0 }
  0x15   : > { %s203_s30 = scalar_select %p202_p12, %s201_s29, 2 }
  0x16   : > { %227 = sbr.rel (%p432_p13) target bundleno = 30 (0x1e), region = 32 }
  0x17   : > { %s804_s30 = smov (!%p202_p12, %s203_s30), 2 }
  0x18   : > { %s426_s3 = sshll.u32 %s804_s30, 3 }
  0x19   : > { %s207_s6 = scalar_lea.vmem %s785_s0, %s426_s3  ;;  %s219_s17 = scalar_lea.vmem %s786_s1, %s426_s3 }
  0x1b   : > { %vm228_vm0 = vcmask 7168   ;;  %v622_v0 = vmov 0.0  }
  0x1c   : > { %229 = vst.msk [vmem:[#allocation2] sm:$0xff] %vm228_vm0, %v622_v0 }
  0x1d   : > { %230 = vst.msk [vmem:[#allocation3] sm:$0xff] %vm228_vm0, %v622_v0 }
  0x1e PF: > { %s434_s23 = sshll.u32 %s201_s29, 3  ;;  %v236_v1 = vlaneseq  ;;  %v623_v3 = vmov 1   ;;  %v231_v5 = vld [vmem:[%s207_s6] sm:$0xff]  ;;  %vm246_vm1 = vcmask 261120   ;;  %s624_s24 = smov 127   ;;  %vm280_vm5 = vcmask 7168  }
  0x1f   : > { %v238_v2 = vstv %s434_s23  ;;  %520 = vset.pattern.permute.xlu0 %v623_v3  ;;  %v232_v9 = vld [vmem:[%s219_s17] sm:$0xff]  ;;  %p435_p0 = scmp.ne.s32.totalorder %s604_s12, 1 }
  0x20   : > { %v237_v4 = vshrl.u32 %v236_v1, 7  ;;  %v257_v20 = vand.u32 127, %v236_v1 }
  0x22   : > { %v239_v6 = vadd.s32 %v238_v2, %v237_v4 }
  0x23   : > { %v278_v29 = vld [vmem:[#allocation2] sm:$0xff] }
  0x24   : > { %vm240_vm2 = vcmp.lt.s32.totalorder %v239_v6, 20  ;;  %v282_v35 = vld [vmem:[#allocation3] sm:$0xff] }
  0x25   : > { %v243_v7 = vsel %vm240_vm2, %v231_v5, 0.0  ;;  %v244_v10 = vsel %vm240_vm2, %v232_v9, 0.0 }
  0x26   : > { %v247_v8 = vsel %vm246_vm1, %v243_v7, -inf  ;;  %v441_v11 = vceil.f32 %v244_v10  ;;  %v442_v12 = vfloor.f32 %v244_v10  ;;  %vm440_vm3 = vcmp.lt.s32.totalorder %v244_v10, 0 }
  0x27   : > { %248 = vmax.xlane.f32.xlu0 %v247_v8 }
  0x28   : > { %v443_v13 = vsel %vm440_vm3, %v441_v11, %v442_v12 }
  0x29   : > { %v444_v14 = vcvt.f32.s32 %v443_v13 }
  0x3b   : > { %259 = vperm.xlu0 %520, %v444_v14  }
  0x9a   : > { %v249_v15 = vpop.xlane.xlu0 %248 }
  0x9b   : > { %v250_v16 = vsub.f32 %v243_v7, %v249_v15 }
  0x9d   : > { %v251_v17 = vmul.f32 1.442695, %v250_v16 }
  0x9f   : > { %521 = vpow2.f32 %v251_v17 }
  0xa5   : > { %v522_v18 = vpop.eup %521 }
  0xa6   : > { %v253_v19 = vsel %vm246_vm1, %v522_v18, 0.0 }
  0xa7   : > { %254 = vadd.xlane.f32.xlu1 %v253_v19 }
  0xad   : > { %v260_v21 = vpop.permute.xlu0 %259 }
  0xae   : > { %vm261_vm4 = vcmp.eq.s32.totalorder %v257_v20, %v260_v21 }
  0xaf   : > { %v262_v22 = vsel %vm261_vm4, %v243_v7, 0.0 }
  0xb0   : > { %v263_v23 = vsel %vm246_vm1, %v262_v22, 0.0 }
  0xb1   : > { %264 = vadd.xlane.f32.xlu2 %v263_v23 }
  0xc0   : > { %271 = vrot.lane.b32.xlu1 %v244_v10, %s624_s24 }
 0x11a   : > { %v255_v24 = vpop.xlane.xlu1 %254 }
 0x11b   : > { %523 = vlog2.f32 %v255_v24 }
 0x121   : > { %v524_v25 = vpop.eup %523 }
 0x122   : > { %v267_v26 = vmul.f32 0.6931472, %v524_v25 }
 0x124   : > { %v268_v27 = vadd.f32 %v267_v26, %v249_v15  ;;  %v265_v28 = vpop.xlane.xlu2 %264 }
 0x126   : > { %v269_v30 = vsub.f32 %v268_v27, %v265_v28 }
 0x128   : > { %v276_v31 = vsel %vm240_vm2, %v269_v30, 0.0 }
 0x129   : > { %v279_v32 = vadd.f32 %v278_v29, %v276_v31 }
 0x12b   : > { %281 = vst.msk [vmem:[#allocation2] sm:$0xff] %vm280_vm5, %v279_v32 }
 0x132   : > { %v272_v33 = vpop.permute.xlu1 %271 }
 0x133   : > { %v274_v34 = vsub.f32 %v244_v10, %v272_v33 }
 0x135   : > { %v275_v36 = vmul.f32 %v274_v34, %v274_v34 }
 0x136   : > { %288 = sbr.rel (%p435_p0) target bundleno = 455 (0x1c7), region = 36 }
 0x137   : > { %v277_v37 = vsel %vm240_vm2, %v275_v36, 0.0 }
 0x138   : > { %v283_v38 = vadd.f32 %v282_v35, %v277_v37 }
 0x13a   : > { %284 = vst.msk [vmem:[#allocation3] sm:$0xff] %vm280_vm5, %v283_v38 }
 0x13b   : > { %v289_v39 = vld [vmem:[#allocation2] sm:$0xff]  ;;  %v625_v41 = vmov 0  }
 0x13c   : > { %525 = vset.pattern.permute.xlu0 %v625_v41  ;;  %v290_v42 = vsel %vm280_vm5, %v289_v39, 0.0 }
 0x13d   : > { %v291_v44 = vrot.slane %v290_v42, 4 }
 0x13f   : > { %v292_v46 = vadd.f32 %v291_v44, %v290_v42 }
 0x141   : > { %v297_v40 = vld [vmem:[#allocation3] sm:$0xff]  ;;  %v293_v48 = vrot.slane %v292_v46, 2 }
 0x142   : > { %v298_v43 = vsel %vm280_vm5, %v297_v40, 0.0 }
 0x143   : > { %v299_v45 = vrot.slane %v298_v43, 4  ;;  %v294_v50 = vadd.f32 %v293_v48, %v292_v46 }
 0x145   : > { %v300_v47 = vadd.f32 %v299_v45, %v298_v43  ;;  %v295_v52 = vrot.slane %v294_v50, 1 }
 0x147   : > { %v301_v49 = vrot.slane %v300_v47, 2  ;;  %v296_v54 = vadd.f32 %v295_v52, %v294_v50 }
 0x149   : > { %v302_v51 = vadd.f32 %v301_v49, %v300_v47  ;;  %v305_v56 = vmul.f32 0.025, %v296_v54 }
 0x14b   : > { %v303_v53 = vrot.slane %v302_v51, 1 }
 0x14d   : > { %v304_v55 = vadd.f32 %v303_v53, %v302_v51 }
 0x14f   : > { %v306_v57 = vmul.f32 0.025, %v304_v55 }
 0x151   : > { %v307_v58 = vadd.f32 %v306_v57, %v305_v56 }
 0x153   : > { %310 = vperm.xlu0 %525, %v307_v58  }
 0x1c5   : > { %v311_v59 = vpop.permute.xlu0 %310 }
 0x1c6   : > { %313 = vst [vmem:[%s199_s18] sm:$0xff] %v311_v59 }
 0x1c7 PF: > { %s437_s12 = sshll.u32 %s608_s13, 3  ;;  %s327_s3 = sshll.u32 %s199_s18, 4  ;;  %s328_s3 = int_to_ptr.vmem [resolvable:$true] %s327_s3 }
 0x1c8   : > { %s325_s30 = scalar_lea.hbm %s787_s2, %s437_s12  ;;  %s315_s5 = scalar_lea.sflag [#allocation5], %s197_s26 }
 0x1c9   : > { %s329_s4 = sshll.u32 %s325_s30, 4  ;;  %s546_s17 = scalar_lea.hbm %s787_s2, 16  ;;  %s330_s4 = int_to_ptr.hbm [resolvable:$true] %s329_s4 }
 0x1ca   : > { %s540_s6 = sshra.s32 %s330_s4, 4  ;;  %s541_s6 = int_to_ptr.hbm [resolvable:$true] %s540_s6 }
 0x1cb   : > { %s542_s7 = scalar_lea.hbm %s541_s6, 8  ;;  %p547_p5 = scmp.lt.s32.totalorder %s541_s6, %s787_s2 }
 0x1cc   : > { %p543_p1 = scmp.ne.s32.totalorder %s541_s6, %s542_s7  ;;  %p548_p6 = scmp.lt.s32.totalorder %s546_s17, %s542_s7 }
 0x1ce   : > { %p544_p2 = pnand %p543_p1, %p690_p3  ;;  %p549_p7 = por %p548_p6, %p547_p5 }
 0x1d0   : > { %p545_p4 = pneg %p544_p2 }
 0x1d2   : > { %p550_p8 = pnand %p549_p7, %p545_p4 }
 0x1d4   : > { %553 = shalt.err (!%p550_p8)
}
 0x1d5   : > { %445 = dma.vmem_to_hbm [thread:$0]  (%p690_p3), %s328_s3, 128, %s330_s4, %s315_s5  }
 0x1d6 PF: > { %p451_p10 = scmp.ge.s32.totalorder %s620_s16, 2  ;;  %s341_s26 = sand.u32 1, %s592_s9  }
 0x1d7   : > { %s342_s28 = scalar_lea.sflag [#allocation5], %s341_s26 }
 0x1d8   : > { %p448_p11 = pnand %p451_p10, %p700_p9 }
 0x1da   : > { %p449_p12 = pneg %p448_p11 }
 0x1dc   : > { %587 = dma.done.wait (%p449_p12), %s342_s28, 128  }
 0x1dd   : > { %589 = vsyncadd (%p449_p12), %s342_s28, 4294967168  ;;  %s15_s16 = sadd.s32 1, %s620_s16   ;;  %s790_s9 = smov %s596_s10 }
 0x1de   : > { %p12_p13 = scmp.ge.s32.totalorder %s15_s16, 6   ;;  %s791_s10 = smov %s600_s11 }
 0x1df   : > { %s792_s11 = smov %s708_s25  ;;  %s793_s12 = smov %s612_s14 }
 0x1e0   : > { %s794_s13 = smov %s616_s15  ;;  %s795_s14 = smov %s798_s19 }
 0x1e1   : > { %s796_s15 = smov %s802_s20  ;;  %14 = sbr.rel (!%p12_p13) target bundleno = 5 (0x5), region = 74 }
 0x1e6   :  { %348 = vsyncpa [#allocation5], 1 }
 0x1e7   :  { %350 = vsyncpa [#allocation5 + $0x1], 1 }

</bundles_post_ra>
